<compile_context>
chip_gen: v5e
topology: v5e:2x2
jax: 0.10.0
libtpu: 0.0.40
codegen_flags: <defaults>
</compile_context>

<pallas_src>
import functools

import jax
import jax.numpy as jnp
from jax.experimental import pallas as pl
from jax.experimental.pallas import tpu as pltpu


def _copy_kernel(x_ref, o_ref):
    # Encoder(Identity) -> Decoder(Identity): pure pass-through of the tile.
    o_ref[...] = x_ref[...]


def _pick_lane_width(total_elems: int, in_dim: int) -> int:
    """Widest lane-dense (multiple-of-128) slab width that tiles the data."""
    for w in (512, 256, 128):
        if total_elems % w == 0:
            return w
    # Fallback: full last dim (a block dim equal to the full array dim always
    # satisfies the BlockSpec (8, 128) rule, just with masked stores).
    return in_dim


def _identity_copy(flat: jax.Array) -> jax.Array:
    """Tiled VMEM pass-through copy of a 2-D row-major slab."""
    rows, width = flat.shape
    itemsize = flat.dtype.itemsize

    # Target ~2 MiB per block; round tile rows to a multiple of 32 so the
    # sublane constraint holds for f32 / bf16 / int8 alike.  If the array is
    # smaller than one target block, use the full row extent (== full dim).
    target_block_bytes = 2 * 1024 * 1024
    rows_for_target = max(32, (target_block_bytes // (width * itemsize)) // 32 * 32)
    tile_rows = min(rows_for_target, rows)
    grid = (pl.cdiv(rows, tile_rows),)

    return pl.pallas_call(
        _copy_kernel,
        out_shape=jax.ShapeDtypeStruct((rows, width), flat.dtype),
        grid_spec=pltpu.PrefetchScalarGridSpec(
            num_scalar_prefetch=0,
            grid=grid,
            in_specs=[pl.BlockSpec((tile_rows, width), lambda i: (i, 0))],
            out_specs=pl.BlockSpec((tile_rows, width), lambda i: (i, 0)),
        ),
        compiler_params=pltpu.CompilerParams(
            dimension_semantics=("parallel",),
        ),
    )(flat)


@functools.partial(jax.jit, static_argnames=("in_dim",))
def identity_vae_forward(X: jax.Array, in_dim: int):
    """JAX/Pallas equivalent of IdentityVAE.forward.

    Args:
        X: input design(s), any leading shape, last dim == in_dim.
        in_dim: number of flattened input dimensions (== latent_size).

    Returns:
        (X_flat, mu, logvar) with X_flat of shape (-1, in_dim) and
        mu = logvar = None, matching the PyTorch module.
    """
    assert X.shape[-1] == in_dim, "last dim must equal in_dim"

    # Glue (free, row-major): X.view(-1, X.size(-1))
    x2d = X.reshape(-1, in_dim)
    n_rows = x2d.shape[0]

    # Re-view the same row-major data as a lane-dense slab for the copy.
    width = _pick_lane_width(x2d.size, in_dim)
    flat = x2d.reshape(-1, width)

    out = _identity_copy(flat)

    # Back to the semantic (-1, in_dim) shape (free reshape).
    recon = out.reshape(n_rows, in_dim)

    # encode() returns (X, None, None); decode() is identity.
    mu, logvar = None, None
    return recon, mu, logvar


if __name__ == "__main__":
    # IdentityVAE(in_dim) has no trainable parameters (encoder/decoder are
    # Identity), so there is nothing to initialize beyond the input.
    in_dim = 16
    key = jax.random.PRNGKey(0)
    # Batch of designs: shape (2, 4, 16, 16) -> flattened by forward to (128, 16).
    X = jax.random.normal(key, (2, 4, 16, in_dim), dtype=jnp.float32)

    recon, mu, logvar = identity_vae_forward(X, in_dim)
    recon = jax.block_until_ready(recon)

    # Correctness check against the reference semantics.
    ref = X.reshape(-1, in_dim)
    assert recon.shape == ref.shape
    assert mu is None and logvar is None
    assert bool(jnp.array_equal(recon, ref)), "identity forward mismatch"

    print("KERNEL_OK")
</pallas_src>

<mosaic_0001>
module attributes {stable_mosaic.version = 11 : i64} {
  func.func @_copy_kernel(%arg0: i32, %arg1: memref<4x512xf32, #tpu.memory_space<vmem>>, %arg2: memref<4x512xf32, #tpu.memory_space<vmem>>) attributes {dimension_semantics = [#tpu.dimension_semantics<parallel>], iteration_bounds = array<i64: 1>, scalar_prefetch = 0 : i64, scratch_operands = 0 : i64, tpu.core_type = #tpu.core_type<tc>, window_params = [{transform_indices = @transform_0, window_bounds = array<i64: 4, 512>}, {transform_indices = @transform_1, window_bounds = array<i64: 4, 512>}]} {
    %c0 = arith.constant 0 : index
    %c0_0 = arith.constant 0 : index
    %0 = vector.load %arg1[%c0, %c0_0] : memref<4x512xf32, #tpu.memory_space<vmem>>, vector<4x512xf32>
    %c0_1 = arith.constant 0 : index
    %c0_2 = arith.constant 0 : index
    %1 = vector.load %arg2[%c0_1, %c0_2] : memref<4x512xf32, #tpu.memory_space<vmem>>, vector<4x512xf32>
    tpu.vector_store %arg2[%c0_1, %c0_2], %0 {strides = array<i32>} : memref<4x512xf32, #tpu.memory_space<vmem>>, vector<4x512xf32>,
    return
  }
  func.func @transform_0(%arg0: i32) -> (i32, i32) {
    %c0_i32 = arith.constant 0 : i32
    %c0_i32_0 = arith.constant 0 : i32
    return %arg0, %c0_i32 : i32, i32
  }
  func.func @transform_1(%arg0: i32) -> (i32, i32) {
    %c0_i32 = arith.constant 0 : i32
    %c0_i32_0 = arith.constant 0 : i32
    return %arg0, %c0_i32 : i32, i32
  }
}

</mosaic_0001>

<bundles_post_ra>
// kernel: identity_vae_forward.1
= control target key start
LH: loop header
LB: loop body
LE: loop exit
PB: predicated region body
PF: predicated region fallthrough
CT: control target
= control target key end

     0   :  { %s38_s0 = inlined_call_operand.vmem [shape: f32[4,512], index: 0, kind: input, shape index: {}]   ;;  %s39_s1 = inlined_call_operand.vmem [shape: f32[4,512], index: 1, kind: output, shape index: {}]  }
   0x1   :  { %v8_v0 = vld [vmem:[%s38_s0] sm:$0xff]  ;;  %v9_v1 = vld [vmem:[%s38_s0 + $0x8] sm:$0xff] }
   0x2   :  { %10 = vst [vmem:[%s39_s1] sm:$0xff] %v8_v0 }
   0x3   :  { %11 = vst [vmem:[%s39_s1 + $0x8] sm:$0xff] %v9_v1 }

</bundles_post_ra>
